<compile_context>
chip_gen: v6e
topology: v6e:2x2x1
jax: 0.10.0
libtpu: 0.0.40
codegen_flags: <defaults>
</compile_context>

<pallas_src>
import functools
import math

import jax
import jax.numpy as jnp
from jax.experimental import pallas as pl
from jax.experimental.pallas import tpu as pltpu

BLOCK_SIZE = 32     # max sequence length the causal mask supports
N_EMBD = 64
DROPOUT = 0.0       # p == 0.0 -> dropout is the identity; nothing to do in-kernel


def _attn_head_kernel(x_ref, wqkv_ref, o_ref, *, batch_block, seq_len, head_size):
    # x_ref:   (Bb*T, C) bf16   -- flattened batch*time rows
    # wqkv_ref:(C, 3H)   bf16   -- [q*scale | k | v] fused, scale pre-folded into q cols
    # o_ref:   (Bb, T*H) or (Bb, T, H), wrapper-chosen (lane-dense when possible)
    Bb, T, H = batch_block, seq_len, head_size

    # Fused QKV projection: one 2-D MXU matmul (M = Bb*T, K = C, N = 3H), f32 accumulate.
    qkv = jnp.dot(x_ref[...], wqkv_ref[...],
                  preferred_element_type=jnp.float32)              # (Bb*T, 3H) f32

    # Static last-axis slices; the softmax scale is already folded into the q weights.
    q = qkv[:, 0 * H:1 * H].astype(jnp.bfloat16).reshape(Bb, T, H)
    k = qkv[:, 1 * H:2 * H].astype(jnp.bfloat16).reshape(Bb, T, H)
    v = qkv[:, 2 * H:3 * H].astype(jnp.bfloat16).reshape(Bb, T, H)

    # Batched attention scores, contracting over H with k un-transposed (no XLU transpose).
    scores = jax.lax.dot_general(
        q, k, dimension_numbers=(((2,), (2,)), ((0,), (0,))),
        preferred_element_type=jnp.float32)                        # (Bb, T, T) f32

    # Causal (lower-triangular) additive bias built once at (T, T), broadcast over Bb.
    # The block always holds the full T (no padded key columns), and the diagonal is kept,
    # so every softmax row has at least one finite entry.
    row = jax.lax.broadcasted_iota(jnp.int32, (T, T), 0)
    col = jax.lax.broadcasted_iota(jnp.int32, (T, T), 1)
    bias = jnp.where(col <= row, 0.0, -jnp.inf).astype(jnp.float32)
    scores = scores + bias[None, :, :]

    # Numerically stable softmax; all element-wise math in f32 (v5e-friendly).
    m = jnp.max(scores, axis=-1, keepdims=True)
    p = jnp.exp(scores - m)
    p = p * pl.reciprocal(jnp.sum(p, axis=-1, keepdims=True), approx=True)

    # dropout(p=0.0) is the identity -> skipped in-kernel.
    out = jax.lax.dot_general(
        p.astype(jnp.bfloat16), v,
        dimension_numbers=(((2,), (1,)), ((0,), (0,))),
        preferred_element_type=jnp.float32)                        # (Bb, T, H) f32

    # Store in whatever (possibly lane-dense flattened) block shape the wrapper chose.
    o_ref[...] = out.reshape(o_ref.shape).astype(o_ref.dtype)


def _pick_batch_block(B, T, *, min_steps=4, cap=128):
    """Pick the per-grid-step batch slab Bb.

    Targets: >= min_steps grid steps (>= 2 per v7x TensorCore so double-buffering can hide
    the x DMA), Bb <= cap (keeps the lane-padded intermediates well under v7x's 64 MiB
    VMEM), Bb*T a multiple of 8 (clean sublane tiling of the 2-D x block), and ideally
    Bb a multiple of 8 so the output slab can be lane-dense.
    """
    target = min(cap, max(1, B // min_steps))
    best = None
    for bb in range(target, 0, -1):
        if B % bb:
            continue
        if (bb * T) % 8 and bb != B:
            continue
        if bb % 8 == 0:
            return bb
        if best is None:
            best = bb
    return best if best is not None else B


def self_attention_head(x, w_key, w_query, w_value, *, batch_block=None):
    """x: (B, T, C) float32, w_*: (C, head_size). Returns (B, T, head_size) float32."""
    B, T, C = x.shape
    assert T <= BLOCK_SIZE, "sequence length exceeds causal_mask block_size"
    assert C == N_EMBD
    H = w_key.shape[1]
    scale = H ** (-0.5)

    # Fuse the projection weights into one (C, 3H) bf16 operand with the softmax scale
    # folded into the query columns; stream x as a flat bf16 (B*T, C) slab.
    w_qkv = jnp.concatenate([w_query * scale, w_key, w_value], axis=1).astype(jnp.bfloat16)
    x2d = x.astype(jnp.bfloat16).reshape(B * T, C)

    Bb = _pick_batch_block(B, T) if batch_block is None else batch_block
    assert B % Bb == 0, "batch_block must divide the batch"
    grid = (B // Bb,)

    # Lane-dense 2-D output slab when the tile constraints allow it
    # ((Bb, T*H): sublane dim multiple of 8 or full batch, lane dim multiple of 128).
    lane_dense = ((T * H) % 128 == 0) and (Bb % 8 == 0 or Bb == B)
    if lane_dense:
        out_shape = jax.ShapeDtypeStruct((B, T * H), x.dtype)
        out_spec = pl.BlockSpec((Bb, T * H), lambda b: (b, 0))
    else:
        out_shape = jax.ShapeDtypeStruct((B, T, H), x.dtype)
        out_spec = pl.BlockSpec((Bb, T, H), lambda b: (b, 0, 0))

    out = pl.pallas_call(
        functools.partial(_attn_head_kernel, batch_block=Bb, seq_len=T, head_size=H),
        out_shape=out_shape,
        grid_spec=pltpu.PrefetchScalarGridSpec(
            num_scalar_prefetch=0,
            grid=grid,
            in_specs=[
                pl.BlockSpec((Bb * T, C), lambda b: (b, 0)),
                pl.BlockSpec((C, 3 * H), lambda b: (0, 0)),
            ],
            out_specs=out_spec,
        ),
        compiler_params=pltpu.CompilerParams(
            dimension_semantics=("parallel",)),
    )(x2d, w_qkv)

    return out.reshape(B, T, H)


def _reference(x, w_key, w_query, w_value):
    """Pure-JAX f32 reference mirroring the PyTorch forward."""
    head_size = w_key.shape[1]
    k = x @ w_key
    q = x @ w_query
    v = x @ w_value
    scores = (q @ jnp.swapaxes(k, -2, -1)) * head_size ** (-0.5)
    T = x.shape[1]
    mask = jnp.tril(jnp.ones((T, T)))
    scores = jnp.where(mask == 0, -jnp.inf, scores)
    probs = jax.nn.softmax(scores, axis=-1)
    return probs @ v


if __name__ == "__main__":
    key = jax.random.PRNGKey(0)
    B, T, C = 32, 8, N_EMBD      # B=32 -> Bb=8, grid=4 (>= 2 steps per v7x TC), lane-dense out
    head_size = 16               # T*H = 128 -> lane-dense output slab

    kx, kk, kq, kv = jax.random.split(key, 4)
    x = jax.random.normal(kx, (B, T, C), dtype=jnp.float32)

    # Deterministic "Kaiming-uniform"-style init matching nn.Linear shapes
    # (PyTorch weight is (head_size, n_embd); we keep its transpose (n_embd, head_size)).
    bound = 1.0 / math.sqrt(C)
    w_key_p = jax.random.uniform(kk, (C, head_size), jnp.float32, -bound, bound)
    w_query_p = jax.random.uniform(kq, (C, head_size), jnp.float32, -bound, bound)
    w_value_p = jax.random.uniform(kv, (C, head_size), jnp.float32, -bound, bound)

    out = self_attention_head(x, w_key_p, w_query_p, w_value_p)
    out = jax.block_until_ready(out)

    ref = _reference(x, w_key_p, w_query_p, w_value_p)
    assert out.shape == (B, T, head_size)
    # bf16 streaming + bf16 MXU operands + approx reciprocal -> relaxed tolerance vs the
    # pure-f32 reference (deliberate accuracy trade-off, not exact parity).
    max_err = float(jnp.max(jnp.abs(out - ref)))
    assert jnp.allclose(out, ref, atol=5e-2, rtol=5e-2), f"mismatch vs reference (max abs err {max_err})"

    print("KERNEL_OK")
</pallas_src>

<mosaic_0001>
module attributes {stable_mosaic.version = 11 : i64} {
  func.func @_attn_head_kernel(%arg0: i32, %arg1: memref<64x64xbf16, #tpu.memory_space<vmem>>, %arg2: memref<64x48xbf16, #tpu.memory_space<vmem>>, %arg3: memref<8x128xf32, #tpu.memory_space<vmem>>) attributes {dimension_semantics = [#tpu.dimension_semantics<parallel>], iteration_bounds = array<i64: 4>, scalar_prefetch = 0 : i64, scratch_operands = 0 : i64, tpu.core_type = #tpu.core_type<tc>, window_params = [{transform_indices = @transform_0, window_bounds = array<i64: 64, 64>}, {pipeline_mode = #tpu.pipeline_mode<synchronous>, transform_indices = @transform_1, window_bounds = array<i64: 64, 48>}, {transform_indices = @transform_2, window_bounds = array<i64: 8, 128>}]} {
    %c0 = arith.constant 0 : index
    %c0_0 = arith.constant 0 : index
    %0 = vector.load %arg1[%c0, %c0_0] : memref<64x64xbf16, #tpu.memory_space<vmem>>, vector<64x64xbf16>
    %c0_1 = arith.constant 0 : index
    %c0_2 = arith.constant 0 : index
    %1 = vector.load %arg2[%c0_1, %c0_2] : memref<64x48xbf16, #tpu.memory_space<vmem>>, vector<64x48xbf16>
    %cst = arith.constant dense<0.000000e+00> : vector<64x48xf32>
    %2 = tpu.matmul %0, %1, %cst {dimension_numbers = #tpu.dot_dimension_numbers<[1], [0], [0], [1], [0, 0, 1, 1], [], []>} : vector<64x64xbf16>, vector<64x48xbf16>, vector<64x48xf32> -> vector<64x48xf32>
    %3 = vector.extract_strided_slice %2 {offsets = [0, 0], sizes = [64, 16], strides = [1, 1]} : vector<64x48xf32> to vector<64x16xf32>
    %4 = arith.truncf %3 : vector<64x16xf32> to vector<64x16xbf16>
    %5 = vector.shape_cast %4 : vector<64x16xbf16> to vector<8x8x16xbf16>
    %6 = vector.extract_strided_slice %2 {offsets = [0, 16], sizes = [64, 16], strides = [1, 1]} : vector<64x48xf32> to vector<64x16xf32>
    %7 = arith.truncf %6 : vector<64x16xf32> to vector<64x16xbf16>
    %8 = vector.shape_cast %7 : vector<64x16xbf16> to vector<8x8x16xbf16>
    %9 = vector.extract_strided_slice %2 {offsets = [0, 32], sizes = [64, 16], strides = [1, 1]} : vector<64x48xf32> to vector<64x16xf32>
    %10 = arith.truncf %9 : vector<64x16xf32> to vector<64x16xbf16>
    %11 = vector.shape_cast %10 : vector<64x16xbf16> to vector<8x8x16xbf16>
    %cst_3 = arith.constant dense<0.000000e+00> : vector<8x8x8xf32>
    %12 = tpu.matmul %5, %8, %cst_3 {dimension_numbers = #tpu.dot_dimension_numbers<[2], [2], [1], [1], [0, 0, 0, 1, 1, 1], [0], [0]>} : vector<8x8x16xbf16>, vector<8x8x16xbf16>, vector<8x8x8xf32> -> vector<8x8x8xf32>
    %13 = tpu.iota {dimensions = array<i32: 0>} : vector<8x8xi32>
    %14 = tpu.iota {dimensions = array<i32: 1>} : vector<8x8xi32>
    %15 = arith.cmpi sle, %14, %13 : vector<8x8xi32>
    %cst_4 = arith.constant 0.000000e+00 : f32
    %cst_5 = arith.constant 0xFF800000 : f32
    %16 = vector.broadcast %cst_4 : f32 to vector<8x8xf32>
    %17 = vector.broadcast %cst_5 : f32 to vector<8x8xf32>
    %18 = arith.select %15, %16, %17 : vector<8x8xi1>, vector<8x8xf32>
    %19 = vector.shape_cast %18 : vector<8x8xf32> to vector<1x8x8xf32>
    %20 = vector.broadcast %19 : vector<1x8x8xf32> to vector<8x8x8xf32>
    %21 = arith.addf %12, %20 : vector<8x8x8xf32>
    %cst_6 = arith.constant dense<0xFF800000> : vector<8x8xf32>
    %22 = vector.multi_reduction <maximumf>, %21, %cst_6 [2] : vector<8x8x8xf32> to vector<8x8xf32>
    %23 = vector.shape_cast %22 : vector<8x8xf32> to vector<8x8x1xf32>
    %24 = vector.broadcast %23 : vector<8x8x1xf32> to vector<8x8x8xf32>
    %25 = arith.subf %21, %24 : vector<8x8x8xf32>
    %26 = math.exp %25 : vector<8x8x8xf32>
    %cst_7 = arith.constant dense<0.000000e+00> : vector<8x8xf32>
    %27 = vector.multi_reduction <add>, %26, %cst_7 [2] : vector<8x8x8xf32> to vector<8x8xf32>
    %28 = vector.shape_cast %27 : vector<8x8xf32> to vector<8x8x1xf32>
    %29 = tpu.reciprocal %28 {approx = true} : vector<8x8x1xf32> -> vector<8x8x1xf32>
    %30 = vector.broadcast %29 : vector<8x8x1xf32> to vector<8x8x8xf32>
    %31 = arith.mulf %26, %30 : vector<8x8x8xf32>
    %32 = arith.truncf %31 : vector<8x8x8xf32> to vector<8x8x8xbf16>
    %cst_8 = arith.constant dense<0.000000e+00> : vector<8x8x16xf32>
    %33 = tpu.matmul %32, %11, %cst_8 {dimension_numbers = #tpu.dot_dimension_numbers<[2], [1], [1], [2], [0, 0, 0, 1, 1, 2], [0], [0]>} : vector<8x8x8xbf16>, vector<8x8x16xbf16>, vector<8x8x16xf32> -> vector<8x8x16xf32>
    %34 = vector.shape_cast %33 : vector<8x8x16xf32> to vector<8x128xf32>
    %c0_9 = arith.constant 0 : index
    %c0_10 = arith.constant 0 : index
    %35 = vector.load %arg3[%c0_9, %c0_10] : memref<8x128xf32, #tpu.memory_space<vmem>>, vector<8x128xf32>
    tpu.vector_store %arg3[%c0_9, %c0_10], %34 {strides = array<i32>} : memref<8x128xf32, #tpu.memory_space<vmem>>, vector<8x128xf32>,
    return
  }
  func.func @transform_0(%arg0: i32) -> (i32, i32) {
    %c0_i32 = arith.constant 0 : i32
    %c0_i32_0 = arith.constant 0 : i32
    return %arg0, %c0_i32 : i32, i32
  }
  func.func @transform_1(%arg0: i32) -> (i32, i32) {
    %c0_i32 = arith.constant 0 : i32
    %c0_i32_0 = arith.constant 0 : i32
    %c0_i32_1 = arith.constant 0 : i32
    return %c0_i32, %c0_i32_0 : i32, i32
  }
  func.func @transform_2(%arg0: i32) -> (i32, i32) {
    %c0_i32 = arith.constant 0 : i32
    %c0_i32_0 = arith.constant 0 : i32
    return %arg0, %c0_i32 : i32, i32
  }
}

</mosaic_0001>

<bundles_post_ra>
// kernel: tpu_custom_call.1
= control target key start
LH: loop header
LB: loop body
LE: loop exit
PB: predicated region body
PF: predicated region fallthrough
CT: control target
= control target key end

     0   :  { %7 = vsyncpa [#allocation3], 0  ;;  %s2118_s0 = inlined_call_operand.vmem [shape: bf16[256,64], index: 0, kind: input, shape index: {}]   ;;  %s2119_s1 = inlined_call_operand.vmem [shape: bf16[64,48], index: 1, kind: input, shape index: {}]   ;;  %s2120_s2 = inlined_call_operand.hbm [shape: f32[32,128], index: 2, kind: output, shape index: {}]  }
   0x1   :  { %9 = vsyncpa [#allocation3 + $0x1], 0  ;;  %s1818_s9 = smov 0   ;;  %s1820_s10 = smov 0  }
   0x2   :  { %s1822_s11 = smov 0   ;;  %s1824_s12 = smov 0  }
   0x3 LB: > { %s1839_s13 = sadd.s32 4294967295, %s1788_s12   ;;  %s1430_s14 = sadd.s32 4294967294, %s1788_s12   ;;  %s1788_s12 = sphi %s1824_s12, %s2126_s12   ;;  %s1784_s11 = sphi %s1822_s11, %s2125_s11   ;;  %s1780_s10 = sphi %s1820_s10, %s2124_s10   ;;  %s1776_s9 = sphi %s1818_s9, %s2123_s9  }
   0x4   : > { %s1843_s15 = sadd.s32 1, %s1788_s12   ;;  %s69_s16 = sadd.s32 1, %s1784_s11 }
   0x5   : > { %s66_s17 = ssub.s32 %s1788_s12, %s1843_s15  ;;  %p79_p0 = scmp.ne.s32.totalorder %s1784_s11, %s1780_s10 }
   0x6   : > { %p67_p1 = scmp.eq.s32.totalorder %s66_s17, 0  ;;  %p80_p2 = scmp.eq.s32.totalorder %s1839_s13, 3 }
   0x7   : > { %p85_p3 = scmp.ne.s32.totalorder %s1780_s10, %s1776_s9  ;;  %p86_p4 = scmp.eq.s32.totalorder %s1430_s14, 3 }
   0x8   : > { %s1854_s18 = scalar_select %p67_p1, %s1784_s11, %s69_s16  }
   0x9   : > { %p1856_p5 = por %p80_p2, %p79_p0  ;;  %p1860_p6 = por %p86_p4, %p85_p3 }
   0xa   : > { %p1433_p7 = scmp.ge.s32.totalorder %s1788_s12, 1  ;;  %p116_p8 = scmp.lt.s32.totalorder %s1788_s12, 5 }
   0xc   : > { %p117_p9 = pnand %p1433_p7, %p116_p8 }
   0xd   : > { %s1435_s23 = sshll.u32 (!%p117_p9), %s1839_s13, 3  ;;  %s1792_s6 = smov (!%p117_p9), 112  }
   0xe   : > { %120 = sbr.rel (%p117_p9) target bundleno = 1279 (0x4ff), region = 28  ;;  %p139_p10 = scmp.lt.s32.totalorder (!%p117_p9), %s1435_s23, 31 }
   0xf   : > { %s1793_s7 = smov (!%p117_p9), 96   ;;  %s1797_s8 = smov (!%p117_p9), 32  }
  0x10   : > { %s1798_s14 = smov (!%p117_p9), 16   ;;  %s1799_s16 = smov (!%p117_p9), 64  }
  0x11   : > { %s1800_s17 = smov (!%p117_p9), 48   ;;  %s1801_s21 = smov (!%p117_p9), 80  }
  0x12   : > { %s135_s22 = sand.u32 (!%p117_p9), 1, %s1780_s10   ;;  %s1474_s24 = sshll.u32 (!%p117_p9), %s1839_s13, 7 }
  0x13   : > { %v1688_v0 = vld [vmem:[%s2119_s1 + $0x18] sm:$0xff]   ;;  %v1689_v1 = vld [vmem:[%s2119_s1 + $0x10] sm:$0xff]   ;;  %s2128_s23 = smov (!%p139_p10, %s1435_s23), 31  ;;  %v1690_v2 = vld [vmem:[%s2119_s1 + $0x8] sm:$0xff]   ;;  %vm205_vm0 = vcmask 523264   ;;  %v1790_v8 = vmov 0.0   ;;  %v307_v43 = vlaneseq  ;;  %s2083_s29 = scalar_lea.hbm %s2120_s2, %s1474_s24 }
  0x14   : > { %1525 = vmatprep.subr.bf16.mxu0 %v1688_v0  ;;  %s1436_s28 = sshll.u32 %s2128_s23, 2  ;;  %v1691_v4 = vld [vmem:[%s2119_s1] sm:$0xff]   ;;  %1541 = vmatprep.subr.bf16.mxu1 %v1790_v8  ;;  %vm1791_vm1 = vmmov 0   ;;  %vm315_vm2 = vcmask 130048   ;;  %vm800_vm3 = vcmask 1043456   ;;  %v1794_v46 = vmov -inf  }
  0x15   : > { %1526 = vmatpush3.bf16.msra.mxu0 %v1688_v0  ;;  %s142_s3 = scalar_lea.vmem %s2118_s0, %s1436_s28  ;;  %1543 = vmatprep.mubr.msk.bf16.mxu1 %vm1791_vm1, %v1790_v8  ;;  %v1971_v44 = vshrl.u32 %v307_v43, 7  ;;  %v310_v45 = vand.u32 127, %v307_v43  ;;  %vm698_vm5 = vcmask 64512   ;;  %vm1345_vm6 = vcmask 261120   ;;  %s1434_s23 = sshll.u32 %s135_s22, 3 }
  0x16   : > { %1527 = vmatprep.subr.bf16.mxu0 %v1689_v1  ;;  %v1692_v3 = vld [vmem:[%s142_s3] sm:$0xff]   ;;  %v1693_v5 = vld [vmem:[%s142_s3 + $0x8] sm:$0xff]   ;;  %v1694_v6 = vld [vmem:[%s142_s3 + $0x10] sm:$0xff]   ;;  %vm1347_vm7 = vcmask 392192   ;;  %vm1350_vm8 = vcmask 654336   ;;  %vm1352_vm9 = vcmask 785408  }
  0x17   : > { %1533 = vmatprep.mubr.msk.bf16.mxu0 %vm205_vm0, %v1692_v3  ;;  %v1695_v7 = vld [vmem:[%s142_s3 + $0x18] sm:$0xff]   ;;  %vm311_vm4 = vcmp.le.s32.totalorder %v310_v45, %v1971_v44  ;;  %s137_s25 = scalar_lea.vmem [#allocation2], %s1434_s23  ;;  %vm1354_vm10 = vcmask 916480   ;;  %s1358_s30 = scalar_lea.sflag [#allocation3], %s135_s22 }
  0x18   : > { %v312_v47 = vsel %vm311_vm4, 0.0, %v1794_v46  ;;  %s1371_s26 = sshll.u32 %s137_s25, 4  ;;  %s1802_s13 = smov [#allocation2]   ;;  %s1372_s26 = int_to_ptr.vmem [resolvable:$true] %s1371_s26 }
  0x19   : > { %1528 = vmatpush3.bf16.msra.mxu0 %v1689_v1  ;;  %s1728_s3 = scalar_lea.vmem %s1372_s26, 128  ;;  %s1732_s4 = sshll.u32 %s1802_s13, 4  ;;  %s1733_s4 = int_to_ptr.vmem [resolvable:$false] %s1732_s4 }
  0x1a   : > { %1529 = vmatprep.subr.bf16.mxu0 %v1690_v2  ;;  %p1729_p11 = scmp.ne.s32.totalorder %s1372_s26, %s1728_s3  ;;  %s1734_s5 = scalar_lea.vmem %s1733_s4, 256 }
  0x1b   : > { %p1735_p0 = scmp.lt.s32.totalorder %s1372_s26, %s1733_s4  ;;  %p1736_p1 = scmp.lt.s32.totalorder %s1734_s5, %s1728_s3 }
  0x1c   : > { %p1730_p12 = pnand %p1729_p11, %p1856_p5 }
  0x1d   : > { %1530 = vmatpush3.bf16.msra.mxu0 %v1690_v2  ;;  %p1737_p2 = por %p1736_p1, %p1735_p0 }
  0x1e   : > { %1531 = vmatprep.subr.bf16.mxu0 %v1691_v4  ;;  %p1731_p13 = pneg %p1730_p12 }
  0x20   : > { %p1738_p3 = pnand %p1737_p2, %p1731_p13 }
  0x21   : > { %1532 = vmatpush3.bf16.msra.mxu0 %v1691_v4 }
  0x22   : > { %1559 = vmatprep.subr.bf16.mxu0 %v1790_v8 }
  0x24   : > { %1534 = vmatmul.mubr.msk.bf16.vlgmr.msra.gmra.mxu0 %vm205_vm0, %v1693_v5 }
  0x25   : > { %1537 = vmatprep.mubr.msk.bf16.mxu0 %vm205_vm0, %v1694_v6 }
  0x2c   : > { %1538 = vmatmul.mubr.msk.bf16.gmra.mxu0 %vm205_vm0, %v1695_v7 }
  0x2d   : > { %1561 = vmatprep.mubr.msk.bf16.mxu0 %vm1791_vm1, %v1790_v8 }
  0xe4   : > { %v1535_v9 = vpop.f32.mrf.mxu0 }
  0xe5   : > { %v1892_v10 = vpack.c.bf16 %v1535_v9, %v1535_v9 }
  0xe6   : > { %v252_v11 = vpop.f32.mrf.mxu0 }
  0xe7   : > { %v1477_v12 = vpack.c.bf16 %v252_v11, %v252_v11  ;;  %410 = vrot.lane.b32.xlu1 %v1892_v10, %s1792_s6 }
  0xe8   : > { %v1536_v13 = vpop.f32.mrf.mxu0 }
  0xe9   : > { %v1896_v14 = vpack.c.bf16 %v1536_v13, %v1536_v13  ;;  %313 = vrot.lane.b32.xlu0 %v1477_v12, %s1792_s6 }
  0xea   : > { %v255_v15 = vpop.f32.mrf.mxu0 }
  0xeb   : > { %v1899_v16 = vpack.c.bf16 %v255_v15, %v255_v15  ;;  %458 = vrot.lane.b32.xlu1 %v1896_v14, %s1792_s6 }
  0xec   : > { %v1539_v17 = vpop.f32.mrf.mxu0 }
  0xed   : > { %362 = vrot.lane.b32.xlu0 %v1899_v16, %s1792_s6  ;;  %v1907_v21 = vpack.c.bf16 %v1539_v17, %v1539_v17 }
  0xee   : > { %v268_v18 = vpop.f32.mrf.mxu0 }
  0xef   : > { %v1905_v19 = vpack.c.bf16 %v268_v18, %v268_v18 }
  0xf0   : > { %v1540_v20 = vpop.f32.mrf.mxu0 }
  0xf1   : > { %506 = vrot.lane.b32.xlu0 %v1905_v19, %s1792_s6  ;;  %v1913_v24 = vpack.c.bf16 %v1540_v20, %v1540_v20 }
  0xf2   : > { %v271_v22 = vpop.f32.mrf.mxu0 }
  0xf3   : > { %v1911_v23 = vpack.c.bf16 %v271_v22, %v271_v22 }
  0xf5   : > { %554 = vrot.lane.b32.xlu1 %v1911_v23, %s1792_s6  ;;  %602 = vrot.lane.b32.xlu0 %v1907_v21, %s1792_s6 }
  0xf9   : > { %650 = vrot.lane.b32.xlu1 %v1913_v24, %s1792_s6 }
  0xfd   : > { %795 = vrot.lane.b32.xlu1 %v1477_v12, %s1793_s7 }
 0x159   : > { %v411_v25 = vpop.permute.xlu1 %410 }
 0x15a   : > { %v416_v34 = vsel %vm315_vm2, %v411_v25, 0 }
 0x15b   : > { %v314_v26 = vpop.permute.xlu0 %313 }
 0x15c   : > { %v320_v27 = vsel %vm315_vm2, %v314_v26, 0 }
 0x15d   : > { %1542 = vmatpush3.bf16.xpose.msra.mxu1 %v320_v27  ;;  %v459_v28 = vpop.permute.xlu1 %458 }
 0x15e   : > { %v464_v29 = vsel %vm315_vm2, %v459_v28, 0  ;;  %1547 = vmatprep.subr.bf16.mxu1 %v1790_v8 }
 0x15f   : > { %1560 = vmatpush3.bf16.xpose.msra.mxu0 %v464_v29  ;;  %v363_v30 = vpop.permute.xlu0 %362 }
 0x160   : > { %1571 = vmatprep.subr.bf16.mxu0 %v1790_v8  ;;  %v368_v31 = vsel %vm315_vm2, %v363_v30, 0 }
 0x163   : > { %v507_v37 = vpop.permute.xlu0 %506 }
 0x164   : > { %1544 = vmatmul.mubr.msk.bf16.vlgmr.msra.gmra.mxu1 %vm315_vm2, %v1477_v12  ;;  %v512_v38 = vsel %vm315_vm2, %v507_v37, 0 }
 0x165   : > { %1548 = vmatpush3.bf16.xpose.msra.mxu1 %v368_v31  ;;  %1549 = vmatprep.mubr.msk.bf16.mxu1 %vm1791_vm1, %v1790_v8 }
 0x166   : > { %1562 = vmatmul.mubr.msk.bf16.vlgmr.msra.gmra.mxu0 %vm315_vm2, %v1896_v14  ;;  %1553 = vmatprep.subr.bf16.mxu1 %v1790_v8 }
 0x167   : > { %v555_v32 = vpop.permute.xlu1 %554  ;;  %1573 = vmatprep.mubr.msk.bf16.mxu0 %vm1791_vm1, %v1790_v8  ;;  %v603_v39 = vpop.permute.xlu0 %602 }
 0x168   : > { %v560_v33 = vsel %vm315_vm2, %v555_v32, 0  ;;  %v608_v40 = vsel %vm315_vm2, %v603_v39, 0 }
 0x169   : > { %1572 = vmatpush3.bf16.xpose.msra.mxu0 %v560_v33 }
 0x16a   : > { %1583 = vmatprep.subr.bf16.mxu0 %v1790_v8 }
 0x16b   : > { %v651_v35 = vpop.permute.xlu1 %650 }
 0x16c   : > { %1550 = vmatmul.mubr.msk.bf16.vlgmr.msra.gmra.mxu1 %vm315_vm2, %v1899_v16  ;;  %v656_v36 = vsel %vm315_vm2, %v651_v35, 0 }
 0x16d   : > { %1554 = vmatpush3.bf16.xpose.msra.mxu1 %v416_v34  ;;  %1555 = vmatprep.mubr.msk.bf16.mxu1 %vm1791_vm1, %v1790_v8 }
 0x16e   : > { %1565 = vmatprep.subr.bf16.mxu1 %v1790_v8 }
 0x16f   : > { %v796_v41 = vpop.permute.xlu1 %795 }
 0x170   : > { %1574 = vmatmul.mubr.msk.bf16.vlgmr.msra.gmra.mxu0 %vm315_vm2, %v1911_v23  ;;  %v802_v42 = vsel %vm800_vm3, %v796_v41, 0 }
 0x171   : > { %1584 = vmatpush3.bf16.xpose.msra.mxu0 %v656_v36  ;;  %1585 = vmatprep.mubr.msk.bf16.mxu0 %vm1791_vm1, %v1790_v8 }
 0x172   : > { %1595 = vmatprep.subr.bf16.mxu0 %v1790_v8 }
 0x174   : > { %1556 = vmatmul.mubr.msk.bf16.vlgmr.msra.gmra.mxu1 %vm315_vm2, %v1892_v10 }
 0x175   : > { %1566 = vmatpush3.bf16.xpose.msra.mxu1 %v512_v38  ;;  %1567 = vmatprep.mubr.msk.bf16.mxu1 %vm1791_vm1, %v1790_v8 }
 0x176   : > { %1577 = vmatprep.subr.bf16.mxu1 %v1790_v8 }
 0x178   : > { %1586 = vmatmul.mubr.msk.bf16.vlgmr.msra.gmra.mxu0 %vm315_vm2, %v1913_v24 }
 0x179   : > { %1597 = vmatprep.mubr.msk.bf16.mxu0 %vm1791_vm1, %v1790_v8 }
 0x17c   : > { %1568 = vmatmul.mubr.msk.bf16.vlgmr.msra.gmra.mxu1 %vm315_vm2, %v1905_v19 }
 0x17d   : > { %1578 = vmatpush3.bf16.xpose.msra.mxu1 %v608_v40  ;;  %1579 = vmatprep.mubr.msk.bf16.mxu1 %vm1791_vm1, %v1790_v8 }
 0x17e   : > { %1589 = vmatprep.subr.bf16.mxu1 %v1790_v8 }
 0x184   : > { %1580 = vmatmul.mubr.msk.bf16.vlgmr.msra.gmra.mxu1 %vm315_vm2, %v1907_v21 }
 0x185   : > { %1590 = vmatpush3.bf16.msra.mxu1 %v802_v42  ;;  %1591 = vmatprep.mubr.msk.bf16.mxu1 %vm1791_vm1, %v1790_v8 }
 0x186   : > { %1601 = vmatprep.subr.bf16.mxu1 %v1790_v8 }
 0x224   : > { %v356_v48 = vpop.f32.mrf.mxu1 }
 0x225   : > { %v357_v49 = vadd.f32 %v356_v48, %v312_v47 }
 0x226   : > { %v1545_v50 = vpop.f32.mrf.mxu1  ;;  %v500_v51 = vpop.f32.mrf.mxu0 }
 0x227   : > { %v501_v52 = vadd.f32 %v500_v51, %v312_v47  ;;  %v699_v53 = vsel %vm698_vm5, %v357_v49, -inf }
 0x228   : > { %v359_v54 = vpop.f32.mrf.mxu1  ;;  %700 = vmax.xlane.f32.xlu0 %v699_v53  ;;  %v1563_v55 = vpop.f32.mrf.mxu0 }
 0x229   : > { %v708_v58 = vsel %vm698_vm5, %v501_v52, -inf }
 0x22a   : > { %v1546_v56 = vpop.f32.mrf.mxu1  ;;  %v503_v57 = vpop.f32.mrf.mxu0 }
 0x22c   : > { %v404_v59 = vpop.f32.mrf.mxu1  ;;  %709 = vmax.xlane.f32.xlu0 %v708_v58  ;;  %v1564_v60 = vpop.f32.mrf.mxu0 }
 0x22d   : > { %v405_v61 = vadd.f32 %v404_v59, %v312_v47 }
 0x22e   : > { %v1551_v62 = vpop.f32.mrf.mxu1 }
 0x22f   : > { %v702_v63 = vsel %vm698_vm5, %v405_v61, -inf }
 0x230   : > { %v407_v0 = vpop.f32.mrf.mxu1  ;;  %703 = vmax.xlane.f32.xlu1 %v702_v63  ;;  %v596_v1 = vpop.f32.mrf.mxu0 }
 0x231   : > { %v1977_v2 = vadd.f32 %v596_v1, %v312_v47 }
 0x232   : > { %v1552_v3 = vpop.f32.mrf.mxu1  ;;  %v1575_v4 = vpop.f32.mrf.mxu0 }
 0x233   : > { %v714_v5 = vsel %vm698_vm5, %v1977_v2, -inf }
 0x234   : > { %v452_v6 = vpop.f32.mrf.mxu1  ;;  %715 = vmax.xlane.f32.xlu0 %v714_v5  ;;  %v599_v7 = vpop.f32.mrf.mxu0 }
 0x235   : > { %v453_v9 = vadd.f32 %v452_v6, %v312_v47 }
 0x236   : > { %v1557_v11 = vpop.f32.mrf.mxu1  ;;  %v1576_v12 = vpop.f32.mrf.mxu0 }
 0x237   : > { %v705_v13 = vsel %vm698_vm5, %v453_v9, -inf }
 0x238   : > { %v455_v15 = vpop.f32.mrf.mxu1  ;;  %706 = vmax.xlane.f32.xlu0 %v705_v13  ;;  %v692_v17 = vpop.f32.mrf.mxu0 }
 0x239   : > { %v1982_v18 = vadd.f32 %v692_v17, %v312_v47 }
 0x23a   : > { %v1558_v20 = vpop.f32.mrf.mxu1  ;;  %v1587_v22 = vpop.f32.mrf.mxu0 }
 0x23b   : > { %v720_v25 = vsel %vm698_vm5, %v1982_v18, -inf }
 0x23c   : > { %v548_v26 = vpop.f32.mrf.mxu1  ;;  %721 = vmax.xlane.f32.xlu0 %v720_v25  ;;  %v695_v27 = vpop.f32.mrf.mxu0 }
 0x23d   : > { %v549_v36 = vadd.f32 %v548_v26, %v312_v47 }
 0x23e   : > { %v1569_v28 = vpop.f32.mrf.mxu1  ;;  %v1588_v29 = vpop.f32.mrf.mxu0 }
 0x23f   : > { %v711_v38 = vsel %vm698_vm5, %v549_v36, -inf }
 0x240   : > { %v551_v30 = vpop.f32.mrf.mxu1 }
 0x241   : > { %892 = vrot.lane.b32.xlu1 %v1892_v10, %s1793_s7 }
 0x242   : > { %v1570_v31 = vpop.f32.mrf.mxu1 }
 0x244   : > { %v644_v32 = vpop.f32.mrf.mxu1 }
 0x245   : > { %v645_v37 = vadd.f32 %v644_v32, %v312_v47 }
 0x246   : > { %v1581_v33 = vpop.f32.mrf.mxu1 }
 0x247   : > { %v717_v39 = vsel %vm698_vm5, %v645_v37, -inf }
 0x248   : > { %v647_v34 = vpop.f32.mrf.mxu1 }
 0x24a   : > { %v1582_v35 = vpop.f32.mrf.mxu1 }
 0x252   : > { %844 = vrot.lane.b32.xlu0 %v1899_v16, %s1793_s7 }
 0x265   : > { %712 = vmax.xlane.f32.xlu1 %v711_v38 }
 0x269   : > { %718 = vmax.xlane.f32.xlu1 %v717_v39 }
 0x27a   : > { %940 = vrot.lane.b32.xlu1 %v1896_v14, %s1793_s7 }
 0x2b1   : > { %v701_v10 = vpop.xlane.xlu0 %700 }
 0x2b2   : > { %v723_v40 = vsub.f32 %v357_v49, %v701_v10 }
 0x2b4   : > { %v731_v41 = vmul.f32 1.442695, %v723_v40 }
 0x2b5   : > { %v710_v42 = vpop.xlane.xlu0 %709 }
 0x2b6   : > { %1696 = vpow2.f32 %v731_v41  ;;  %v726_v43 = vsub.f32 %v501_v52, %v710_v42 }
 0x2b8   : > { %v737_v45 = vmul.f32 1.442695, %v726_v43 }
 0x2b9   : > { %v704_v46 = vpop.xlane.xlu1 %703 }
 0x2ba   : > { %1698 = vpow2.f32 %v737_v45  ;;  %v724_v16 = vsub.f32 %v405_v61, %v704_v46 }
 0x2bc   : > { %v733_v47 = vmul.f32 1.442695, %v724_v16 }
 0x2bd   : > { %v716_v48 = vpop.xlane.xlu0 %715  ;;  %v893_v61 = vpop.permute.xlu1 %892 }
 0x2be   : > { %1700 = vpow2.f32 %v733_v47  ;;  %v728_v60 = vsub.f32 %v1977_v2, %v716_v48  ;;  %v898_v30 = vsel %vm800_vm3, %v893_v61, 0 }
 0x2c0   : > { %v741_v62 = vmul.f32 1.442695, %v728_v60 }
 0x2c1   : > { %v707_v50 = vpop.xlane.xlu0 %706 }
 0x2c2   : > { %v725_v58 = vsub.f32 %v453_v9, %v707_v50 }
 0x2c3   : > { %v1697_v51 = vpop.eup %1696 }
 0x2c4   : > { %v747_v53 = vsel %vm698_vm5, %v1697_v51, 0.0  ;;  %v735_v59 = vmul.f32 1.442695, %v725_v58 }
 0x2c5   : > { %748 = vadd.xlane.f32.xlu1 %v747_v53  ;;  %v722_v54 = vpop.xlane.xlu0 %721 }
 0x2c6   : > { %1702 = vpow2.f32 %v735_v59  ;;  %v730_v63 = vsub.f32 %v1982_v18, %v722_v54 }
 0x2c7   : > { %v1995_v14 = vpop.eup %1698  ;;  %1704 = vpow2.f32 %v741_v62 }
 0x2c8   : > { %v756_v49 = vsel %vm698_vm5, %v1995_v14, 0.0  ;;  %v745_v3 = vmul.f32 1.442695, %v730_v63 }
 0x2c9   : > { %757 = vadd.xlane.f32.xlu0 %v756_v49  ;;  %v845_v52 = vpop.permute.xlu0 %844 }
 0x2ca   : > { %v850_v55 = vsel %vm800_vm3, %v845_v52, 0 }
 0x2cb   : > { %v1701_v56 = vpop.eup %1700  ;;  %1596 = vmatpush3.bf16.msra.mxu0 %v850_v55 }
 0x2cc   : > { %v750_v57 = vsel %vm698_vm5, %v1701_v56, 0.0  ;;  %1607 = vmatprep.subr.bf16.mxu0 %v1790_v8 }
 0x2cd   : > { %751 = vadd.xlane.f32.xlu0 %v750_v57 }
 0x2d3   : > { %v1703_v7 = vpop.eup %1702 }
 0x2d4   : > { %v2009_v2 = vpop.eup %1704 }
 0x2d5   : > { %v762_v11 = vsel %vm698_vm5, %v2009_v2, 0.0 }
 0x2d6   : > { %1036 = vrot.lane.b32.xlu1 %v1911_v23, %s1793_s7 }
 0x2e3   : > { %988 = vrot.lane.b32.xlu0 %v1905_v19, %s1793_s7  ;;  %v753_v19 = vsel %vm698_vm5, %v1703_v7, 0.0 }
 0x2ee   : > { %v713_v0 = vpop.xlane.xlu1 %712 }
 0x2ef   : > { %v727_v1 = vsub.f32 %v549_v36, %v713_v0 }
 0x2f1   : > { %v739_v4 = vmul.f32 1.442695, %v727_v1 }
 0x2f2   : > { %v719_v5 = vpop.xlane.xlu1 %718 }
 0x2f3   : > { %1706 = vpow2.f32 %v739_v4  ;;  %v729_v23 = vsub.f32 %v645_v37, %v719_v5 }
 0x2f4   : > { %1708 = vpow2.f32 %v745_v3 }
 0x2f5   : > { %v743_v6 = vmul.f32 1.442695, %v729_v23 }
 0x2f6   : > { %v941_v20 = vpop.permute.xlu1 %940 }
 0x2f7   : > { %1710 = vpow2.f32 %v743_v6  ;;  %v946_v33 = vsel %vm800_vm3, %v941_v20, 0 }
 0x2fa   : > { %754 = vadd.xlane.f32.xlu1 %v753_v19 }
 0x300   : > { %v2011_v9 = vpop.eup %1706 }
 0x301   : > { %v759_v12 = vsel %vm698_vm5, %v2011_v9, 0.0  ;;  %v2017_v13 = vpop.eup %1708 }
 0x302   : > { %763 = vadd.xlane.f32.xlu0 %v762_v11  ;;  %760 = vadd.xlane.f32.xlu1 %v759_v12  ;;  %v768_v17 = vsel %vm698_vm5, %v2017_v13, 0.0 }
 0x304   : > { %v2019_v15 = vpop.eup %1710 }
 0x305   : > { %v765_v18 = vsel %vm698_vm5, %v2019_v15, 0.0 }
 0x306   : > { %769 = vadd.xlane.f32.xlu0 %v768_v17  ;;  %766 = vadd.xlane.f32.xlu1 %v765_v18 }
 0x317   : > { %1132 = vrot.lane.b32.xlu1 %v1913_v24, %s1793_s7 }
 0x31c   : > { %1084 = vrot.lane.b32.xlu0 %v1907_v21, %s1793_s7 }
 0x34e   : > { %v749_v22 = vpop.xlane.xlu1 %748 }
 0x34f   : > { %1712 = vrcp.f32 %v749_v22 }
 0x352   : > { %v758_v25 = vpop.xlane.xlu0 %757  ;;  %v1037_v35 = vpop.permute.xlu1 %1036 }
 0x353   : > { %v1042_v37 = vsel %vm800_vm3, %v1037_v35, 0 }
 0x356   : > { %v752_v26 = vpop.xlane.xlu0 %751 }
 0x357   : > { %1714 = vrcp.f32 %v752_v26 }
 0x358   : > { %1716 = vrcp.f32 %v758_v25 }
 0x35a   : > { %v989_v39 = vpop.permute.xlu0 %988 }
 0x35b   : > { %v994_v16 = vsel %vm800_vm3, %v989_v39, 0 }
 0x35c   : > { %v1713_v27 = vpop.eup %1712 }
 0x35d   : > { %v779_v28 = vmul.f32 %v1713_v27, %v1697_v51 }
 0x35f   : > { %v787_v29 = vpack.c.bf16 %v779_v28, %v779_v28 }
 0x361   : > { %1592 = vmatmul.mubr.msk.bf16.vlgmr.msra.gmra.mxu1 %vm698_vm5, %v787_v29 }
 0x362   : > { %1602 = vmatpush3.bf16.msra.mxu1 %v898_v30  ;;  %1603 = vmatprep.mubr.msk.bf16.mxu1 %vm1791_vm1, %v1790_v8 }
 0x363   : > { %1613 = vmatprep.subr.bf16.mxu1 %v1790_v8 }
 0x364   : > { %v1715_v21 = vpop.eup %1714 }
 0x365   : > { %v780_v24 = vmul.f32 %v1715_v21, %v1701_v56  ;;  %v1717_v32 = vpop.eup %1716 }
 0x366   : > { %v782_v34 = vmul.f32 %v1717_v32, %v1995_v14 }
 0x367   : > { %v788_v31 = vpack.c.bf16 %v780_v24, %v780_v24  ;;  %v1796_v24 = vmov 1934713408  }
 0x368   : > { %v790_v36 = vpack.c.bf16 %v782_v34, %v782_v34 }
 0x369   : > { %1598 = vmatmul.mubr.msk.bf16.vlgmr.msra.gmra.mxu0 %vm698_vm5, %v788_v31  ;;  %v1247_v31 = vunpack.c.l.s4 %v1796_v24 }
 0x36a   : > { %1608 = vmatpush3.bf16.msra.mxu0 %v946_v33  ;;  %1609 = vmatprep.mubr.msk.bf16.mxu0 %vm1791_vm1, %v1790_v8 }
 0x36b   : > { %1619 = vmatprep.subr.bf16.mxu0 %v1790_v8 }
 0x371   : > { %1610 = vmatmul.mubr.msk.bf16.vlgmr.msra.gmra.mxu0 %vm698_vm5, %v790_v36 }
 0x372   : > { %1620 = vmatpush3.bf16.msra.mxu0 %v1042_v37  ;;  %1621 = vmatprep.mubr.msk.bf16.mxu0 %vm1791_vm1, %v1790_v8 }
 0x373   : > { %1631 = vmatprep.subr.bf16.mxu0 %v1790_v8 }
 0x383   : > { %v755_v38 = vpop.xlane.xlu1 %754 }
 0x384   : > { %1718 = vrcp.f32 %v755_v38  ;;  %v1248_v38 = vunpack.c.0.s8 %v1247_v31 }
 0x38b   : > { %v764_v10 = vpop.xlane.xlu0 %763  ;;  %v761_v40 = vpop.xlane.xlu1 %760 }
 0x38c   : > { %1720 = vrcp.f32 %v764_v10 }
 0x38d   : > { %1722 = vrcp.f32 %v761_v40 }
 0x38f   : > { %v770_v41 = vpop.xlane.xlu0 %769  ;;  %v767_v42 = vpop.xlane.xlu1 %766 }
 0x390   : > { %1724 = vrcp.f32 %v770_v41 }
 0x391   : > { %v1719_v43 = vpop.eup %1718  ;;  %1726 = vrcp.f32 %v767_v42 }
 0x392   : > { %v781_v45 = vmul.f32 %v1719_v43, %v1703_v7 }
 0x393   : > { %v1133_v51 = vpop.permute.xlu1 %1132  ;;  %v1085_v54 = vpop.permute.xlu0 %1084 }
 0x394   : > { %v789_v46 = vpack.c.bf16 %v781_v45, %v781_v45  ;;  %v1138_v56 = vsel %vm800_vm3, %v1133_v51, 0  ;;  %v1090_v57 = vsel %vm800_vm3, %v1085_v54, 0 }
 0x396   : > { %1604 = vmatmul.mubr.msk.bf16.vlgmr.msra.gmra.mxu1 %vm698_vm5, %v789_v46 }
 0x397   : > { %1614 = vmatpush3.bf16.msra.mxu1 %v994_v16  ;;  %1615 = vmatprep.mubr.msk.bf16.mxu1 %vm1791_vm1, %v1790_v8 }
 0x398   : > { %1625 = vmatprep.subr.bf16.mxu1 %v1790_v8 }
 0x399   : > { %v1721_v47 = vpop.eup %1720 }
 0x39a   : > { %v1723_v48 = vpop.eup %1722  ;;  %v784_v50 = vmul.f32 %v1721_v47, %v2009_v2  ;;  %v1795_v2 = vmov 1983009808  }
 0x39b   : > { %v783_v53 = vmul.f32 %v1723_v48, %v2011_v9  ;;  %v1183_v9 = vunpack.c.l.s4 %v1795_v2  ;;  %v1251_v48 = vsub.s32 %v1248_v38, %v1971_v44 }
 0x39c   : > { %v792_v14 = vpack.c.bf16 %v784_v50, %v784_v50 }
 0x39d   : > { %v1725_v49 = vpop.eup %1724  ;;  %v791_v52 = vpack.c.bf16 %v783_v53, %v783_v53  ;;  %v1184_v11 = vunpack.c.0.s8 %v1183_v9 }
 0x39e   : > { %v1727_v55 = vpop.eup %1726  ;;  %1622 = vmatmul.mubr.msk.bf16.vlgmr.msra.gmra.mxu0 %vm698_vm5, %v792_v14  ;;  %v786_v58 = vmul.f32 %v1725_v49, %v2017_v13 }
 0x39f   : > { %1616 = vmatmul.mubr.msk.bf16.vlgmr.msra.gmra.mxu1 %vm698_vm5, %v791_v52  ;;  %1632 = vmatpush3.bf16.msra.mxu0 %v1138_v56  ;;  %v785_v59 = vmul.f32 %v1727_v55, %v2019_v15  ;;  %v1187_v12 = vsub.s32 %v1184_v11, %v1971_v44 }
 0x3a0   : > { %1626 = vmatpush3.bf16.msra.mxu1 %v1090_v57  ;;  %1627 = vmatprep.mubr.msk.bf16.mxu1 %vm1791_vm1, %v1790_v8  ;;  %v794_v60 = vpack.c.bf16 %v786_v58, %v786_v58 }
 0x3a1   : > { %1633 = vmatprep.mubr.msk.bf16.mxu0 %vm1791_vm1, %v1790_v8  ;;  %v793_v61 = vpack.c.bf16 %v785_v59, %v785_v59 }
 0x3a6   : > { %1634 = vmatmul.mubr.msk.bf16.vlgmr.msra.gmra.mxu0 %vm698_vm5, %v794_v60 }
 0x3a7   : > { %1628 = vmatmul.mubr.msk.bf16.vlgmr.msra.gmra.mxu1 %vm698_vm5, %v793_v61 }
 0x421   : > { %v838_v62 = vpop.f32.mrf.mxu1 }
 0x423   : > { %v1593_v63 = vpop.f32.mrf.mxu1 }
 0x425   : > { %v841_v0 = vpop.f32.mrf.mxu1 }
 0x427   : > { %v1594_v1 = vpop.f32.mrf.mxu1 }
 0x429   : > { %v886_v3 = vpop.f32.mrf.mxu0 }
 0x42b   : > { %v1599_v4 = vpop.f32.mrf.mxu0 }
 0x42d   : > { %v889_v5 = vpop.f32.mrf.mxu0 }
 0x42f   : > { %v1600_v23 = vpop.f32.mrf.mxu0 }
 0x431   : > { %v982_v6 = vpop.f32.mrf.mxu0 }
 0x432   : > { %v1197_v13 = vcombine.high %v886_v3, %v982_v6  ;;  %v1196_v36 = vcombine.low %v886_v3, %v982_v6 }
 0x433   : > { %v1611_v7 = vpop.f32.mrf.mxu0 }
 0x434   : > { %v2065_v20 = vrot.slane %v1197_v13, %v1187_v12  ;;  %v1204_v45 = vrot.slane %v1196_v36, %v1187_v12 }
 0x435   : > { %v985_v19 = vpop.f32.mrf.mxu0 }
 0x437   : > { %v1612_v8 = vpop.f32.mrf.mxu0 }
 0x456   : > { %v934_v15 = vpop.f32.mrf.mxu1 }
 0x457   : > { %v1181_v17 = vcombine.high %v838_v62, %v934_v15  ;;  %v1180_v33 = vcombine.low %v838_v62, %v934_v15 }
 0x458   : > { %v1605_v18 = vpop.f32.mrf.mxu1 }
 0x459   : > { %v2067_v22 = vrot.slane %v1181_v17, %v1187_v12  ;;  %v1188_v10 = vrot.slane %v1180_v33, %v1187_v12 }
 0x45a   : > { %v937_v25 = vpop.f32.mrf.mxu1 }
 0x45b   : > { %v1260_v26 = vcombine.low %v2067_v22, %v2065_v20  ;;  %v1261_v27 = vcombine.high %v2067_v22, %v2065_v20  ;;  %v1244_v54 = vcombine.low %v1188_v10, %v1204_v45  ;;  %v1245_v14 = vcombine.high %v1188_v10, %v1204_v45 }
 0x45c   : > { %v1606_v28 = vpop.f32.mrf.mxu1 }
 0x45d   : > { %v1259_v62 = vrot.slane %v1245_v14, %v1251_v48  ;;  %v1252_v0 = vrot.slane %v1244_v54, %v1251_v48  ;;  %v1268_v6 = vrot.slane %v1260_v26, %v1251_v48  ;;  %v1275_v2 = vrot.slane %v1261_v27, %v1251_v48 }
 0x45e   : > { %v1078_v29 = vpop.f32.mrf.mxu0 }
 0x45f   : > { %v1030_v30 = vpop.f32.mrf.mxu1 }
 0x460   : > { %v1623_v21 = vpop.f32.mrf.mxu0 }
 0x461   : > { %v1617_v32 = vpop.f32.mrf.mxu1 }
 0x462   : > { %v1081_v34 = vpop.f32.mrf.mxu0 }
 0x463   : > { %v1033_v35 = vpop.f32.mrf.mxu1 }
 0x464   : > { %v1624_v37 = vpop.f32.mrf.mxu0 }
 0x465   : > { %v1618_v39 = vpop.f32.mrf.mxu1 }
 0x466   : > { %v1174_v40 = vpop.f32.mrf.mxu0 }
 0x467   : > { %v1126_v41 = vpop.f32.mrf.mxu1  ;;  %v1228_v42 = vcombine.low %v1078_v29, %v1174_v40  ;;  %v1229_v43 = vcombine.high %v1078_v29, %v1174_v40 }
 0x468   : > { %v1212_v46 = vcombine.low %v1030_v30, %v1126_v41  ;;  %v1213_v16 = vcombine.high %v1030_v30, %v1126_v41  ;;  %v1635_v47 = vpop.f32.mrf.mxu0 }
 0x469   : > { %v1236_v50 = vrot.slane %v1228_v42, %v1187_v12  ;;  %v1243_v51 = vrot.slane %v1229_v43, %v1187_v12  ;;  %v1629_v53 = vpop.f32.mrf.mxu1 }
 0x46a   : > { %v1220_v49 = vrot.slane %v1212_v46, %v1187_v12  ;;  %v1227_v52 = vrot.slane %v1213_v16, %v1187_v12  ;;  %v1177_v55 = vpop.f32.mrf.mxu0 }
 0x46b   : > { %v1129_v56 = vpop.f32.mrf.mxu1 }
 0x46c   : > { %v1276_v57 = vcombine.low %v1220_v49, %v1236_v50  ;;  %v1277_v58 = vcombine.high %v1220_v49, %v1236_v50  ;;  %v1292_v59 = vcombine.low %v1227_v52, %v1243_v51  ;;  %v1636_v60 = vpop.f32.mrf.mxu0  ;;  %v1293_v3 = vcombine.high %v1227_v52, %v1243_v51 }
 0x46d   : > { %v1630_v61 = vpop.f32.mrf.mxu1 }
 0x46e   : > { %v1291_v63 = vrot.slane %v1277_v58, %v1251_v48  ;;  %v1284_v1 = vrot.slane %v1276_v57, %v1251_v48  ;;  %v1300_v5 = vrot.slane %v1292_v59, %v1251_v48  ;;  %v1307_v8 = vrot.slane %v1293_v3, %v1251_v48 }
 0x470   : > { %v1310_v44 = vcombine.low %v1259_v62, %v1291_v63  ;;  %v1309_v4 = vcombine.high %v1252_v0, %v1284_v1  ;;  %v1308_v23 = vcombine.low %v1252_v0, %v1284_v1  ;;  %v1312_v7 = vcombine.low %v1268_v6, %v1300_v5 }
 0x471   : > { %v1311_v19 = vcombine.high %v1259_v62, %v1291_v63  ;;  %v1314_v9 = vcombine.low %v1275_v2, %v1307_v8  ;;  %v1313_v11 = vcombine.high %v1268_v6, %v1300_v5  ;;  %v1315_v12 = vcombine.high %v1275_v2, %v1307_v8 }
 0x472   : > { %1321 = vrot.lane.b32.xlu1 %v1310_v44, %s1797_s8  ;;  %1317 = vrot.lane.b32.xlu0 %v1309_v4, %s1798_s14 }
 0x476   : > { %1329 = vrot.lane.b32.xlu1 %v1312_v7, %s1799_s16  ;;  %1325 = vrot.lane.b32.xlu0 %v1311_v19, %s1800_s17 }
 0x47a   : > { %1337 = vrot.lane.b32.xlu1 %v1314_v9, %s1793_s7  ;;  %1333 = vrot.lane.b32.xlu0 %v1313_v11, %s1801_s21 }
 0x47e   : > { %1341 = vrot.lane.b32.xlu0 %v1315_v12, %s1792_s6 }
 0x4e4   : > { %v1322_v13 = vpop.permute.xlu1 %1321  ;;  %v1318_v15 = vpop.permute.xlu0 %1317 }
 0x4e5   : > { %v1344_v17 = vsel %vm315_vm2, %v1308_v23, %v1318_v15 }
 0x4e6   : > { %v1346_v22 = vsel %vm1345_vm6, %v1344_v17, %v1322_v13 }
 0x4e8   : > { %v1330_v18 = vpop.permute.xlu1 %1329  ;;  %v1326_v20 = vpop.permute.xlu0 %1325 }
 0x4e9   : > { %v1348_v25 = vsel %vm1347_vm7, %v1346_v22, %v1326_v20 }
 0x4ea   : > { %v1349_v27 = vsel %vm205_vm0, %v1348_v25, %v1330_v18 }
 0x4ec   : > { %v1334_v26 = vpop.permute.xlu0 %1333  ;;  %v1338_v28 = vpop.permute.xlu1 %1337 }
 0x4ed   : > { %v1351_v29 = vsel %vm1350_vm8, %v1349_v27, %v1334_v26 }
 0x4ee   : > { %v1353_v21 = vsel %vm1352_vm9, %v1351_v29, %v1338_v28 }
 0x4f0   : > { %v1342_v30 = vpop.permute.xlu0 %1341 }
 0x4f1   : > { %v1355_v24 = vsel %vm1354_vm10, %v1353_v21, %v1342_v30 }
 0x4f2   : > { %1356 = vst [vmem:[%s137_s25] sm:$0xff] %v1355_v24 }
 0x4f3   : > { %1741 = shalt.err (!%p1738_p3)
}
 0x4f4   : > { %s1742_s6 = scalar_lea.hbm %s2083_s29, 128  ;;  %s1746_s14 = scalar_lea.hbm %s2120_s2, 512 }
 0x4f5   : > { %p1743_p4 = scmp.ne.s32.totalorder %s2083_s29, %s1742_s6  ;;  %p1747_p9 = scmp.lt.s32.totalorder %s2083_s29, %s2120_s2 }
 0x4f6   : > { %p1748_p10 = scmp.lt.s32.totalorder %s1746_s14, %s1742_s6 }
 0x4f7   : > { %p1744_p7 = pnand %p1743_p4, %p1856_p5 }
 0x4f8   : > { %p1749_p11 = por %p1748_p10, %p1747_p9 }
 0x4f9   : > { %p1745_p8 = pneg %p1744_p7 }
 0x4fb   : > { %p1750_p12 = pnand %p1749_p11, %p1745_p8 }
 0x4fd   : > { %1753 = shalt.err (!%p1750_p12)
}
 0x4fe   : > { %1637 = dma.vmem_to_hbm [thread:$0]  (%p1856_p5), %s1372_s26, 128, %s2083_s29, %s1358_s30  }
 0x4ff PF: > { %p1643_p13 = scmp.ge.s32.totalorder %s1788_s12, 2  ;;  %s1383_s21 = sand.u32 1, %s1776_s9  }
 0x500   : > { %s1384_s22 = scalar_lea.sflag [#allocation3], %s1383_s21 }
 0x501   : > { %p1640_p0 = pnand %p1643_p13, %p1860_p6 }
 0x503   : > { %p1641_p1 = pneg %p1640_p0 }
 0x505   : > { %1771 = dma.done.wait (%p1641_p1), %s1384_s22, 128  }
 0x506   : > { %1773 = vsyncadd (%p1641_p1), %s1384_s22, 4294967168  ;;  %p12_p2 = scmp.ge.s32.totalorder %s1843_s15, 6   ;;  %s2123_s9 = smov %s1780_s10 }
 0x507   : > { %s2124_s10 = smov %s1784_s11  ;;  %s2125_s11 = smov %s1854_s18 }
 0x508   : > { %s2126_s12 = smov %s1843_s15  ;;  %14 = sbr.rel (!%p12_p2) target bundleno = 3 (0x3), region = 63 }
 0x50d   :  { %1389 = vsyncpa [#allocation3], 1 }
 0x50e   :  { %1391 = vsyncpa [#allocation3 + $0x1], 1 }

</bundles_post_ra>
